<compile_context>
chip_gen: v7x
topology: tpu7x:2x2x1
jax: 0.10.0
libtpu: 0.0.40
codegen_flags: <defaults>
</compile_context>

<pallas_src>
import functools

import jax
import jax.numpy as jnp
from jax import lax
from jax.experimental import pallas as pl
from jax.experimental.pallas import tpu as pltpu


NEG_SLOPE = 0.3                    # nn.LeakyReLU(0.3) in the reference module
MAX_BLOCK_B = 8192                 # per-step batch-tile cap (keeps v7x VMEM headroom)
VMEM_LIMIT_BYTES = 32 * 1024 * 1024  # > v5e's 16-MiB scoped default, < v7x's 64-MiB physical


def _round_up(n, m):
    return ((n + m - 1) // m) * m


def _choose_tb(batch, max_tb):
    """Batch-tile rows per grid step."""
    if batch <= 1024:
        # Single block: output block width == full output width, so no 128-multiple needed.
        return _round_up(batch, 8)
    # Large batch: lane-dense (multiple-of-128) tile, capped, and sized so the grid has
    # >= 2 "parallel" steps so v7x's two TensorCores can split the batch.
    half = _round_up(-(-batch // 2), 128)
    return max(128, (min(max_tb, half) // 128) * 128)


def classifier_kernel(x_ref, w1_ref, b1_ref, w2_ref, b2_ref, w3_ref, b3_ref,
                      out_ref, *, hid1):
    x = x_ref[...]                                          # (tb, F) f32

    # First layer + label row, computed TRANSPOSED (lane-dense):
    #   a1[k, b] = sum_f w1t[k, f] * x[b, f]      (A.B^T contraction -> (hid1+1, tb))
    # w1t rows [0:hid1) are the Linear(feat, hid1) weights laid over the full input width with
    # the label columns [s:e) zeroed -- this drops them without a wrapper-side concat (note:
    # 0*inf would be NaN, but the label columns are one-hot 0/1 in this model).  Row hid1 is the
    # +/-1 "difference" row giving x[:, s+1] - x[:, s] for the width-2 argmax (its bias is 0 and
    # LeakyReLU preserves the sign, so the compare below stays exact).
    a1 = lax.dot_general(w1_ref[...], x, (((1,), (1,)), ((), ())),
                         preferred_element_type=jnp.float32)
    a1 = a1 + b1_ref[...]                                   # (hid1+1, tb) + (hid1+1, 1)
    a1 = jnp.where(a1 > 0, a1, NEG_SLOPE * a1)              # LeakyReLU(0.3)
    # TODO(synk): Dropout(0.5) is identity at inference; training-mode masking not implemented.

    # label = argmax(x[:, s:s+2], axis=1): 1 iff x[:, s+1] > x[:, s]; tie -> 0 (matches torch).
    lab = (a1[hid1:hid1 + 1, :] > 0).astype(jnp.float32)    # (1, tb)
    h = a1[:hid1, :]                                        # (hid1, tb)

    # Linear(hid1, hid2) -> LeakyReLU(0.3) -> Dropout (identity), still lane-dense.
    h = jnp.dot(w2_ref[...], h, preferred_element_type=jnp.float32) + b2_ref[...]
    h = jnp.where(h > 0, h, NEG_SLOPE * h)

    # Linear(hid2, 1) -> Sigmoid (exact; the EUP slots are otherwise idle here).
    logit = jnp.dot(w3_ref[...], h, preferred_element_type=jnp.float32) + b3_ref[...]  # (1, tb)
    prob = 1.0 / (1.0 + jnp.exp(-logit))

    # Lane-dense (2, tb) output block: two direct slice stores, no concat.
    out_ref[0:1, :] = prob
    out_ref[1:2, :] = lab


def init_params(key, feat_dim, class_dims, out_dim):
    """Deterministic nn.Linear-style init: U(-1/sqrt(fan_in), +1/sqrt(fan_in))."""
    dims = [feat_dim] + list(class_dims) + [out_dim]
    params = []
    keys = jax.random.split(key, len(dims) - 1)
    for k, din, dout in zip(keys, dims[:-1], dims[1:]):
        kw, kb = jax.random.split(k)
        bound = 1.0 / float(din) ** 0.5
        w = jax.random.uniform(kw, (din, dout), jnp.float32, -bound, bound)
        b = jax.random.uniform(kb, (1, dout), jnp.float32, -bound, bound)
        params += [w, b]
    return params


def prepare_params(params, input_dim, start_end):
    """One-time prep: transpose weights, fold the label-column drop and the width-2 argmax
    difference row into the first-layer weight, reshape biases to (rows, 1)."""
    s, e = start_end
    w1, b1, w2, b2, w3, b3 = params          # w1: (feat, hid1), feat = input_dim - (e - s)
    hid1 = w1.shape[1]

    w1t = jnp.zeros((hid1 + 1, input_dim), w1.dtype)
    w1t = w1t.at[:hid1, :s].set(w1[:s, :].T)     # features before the label columns
    w1t = w1t.at[:hid1, e:].set(w1[s:, :].T)     # features after the label columns
    w1t = w1t.at[hid1, s].set(-1.0)              # label-difference row: x[:, s+1] - x[:, s]
    w1t = w1t.at[hid1, s + 1].set(1.0)

    b1t = jnp.concatenate([b1.reshape(hid1, 1), jnp.zeros((1, 1), b1.dtype)], axis=0)
    b2t = b2.reshape(-1, 1)                      # (hid2, 1)
    w2t = w2.T                                   # (hid2, hid1)
    w3t = w3.T                                   # (1, hid2)
    b3t = b3.reshape(1, 1)                       # (1, 1)
    return w1t, b1t, w2t, b2t, w3t, b3t


def classifier_forward(x, packed_params, start_end, *, max_block_b=MAX_BLOCK_B):
    s, e = start_end
    assert e - s == 2, "only the sigmoid head (label width 2) is implemented"
    # TODO(synk): the multi-class branch (width != 2: Linear(hid, width), no Sigmoid) is not implemented.
    w1t, b1t, w2t, b2t, w3t, b3t = packed_params
    B, F = x.shape
    hid1 = w1t.shape[0] - 1
    hid2 = w2t.shape[0]
    assert F == w1t.shape[1]

    tb = _choose_tb(B, max_block_b)
    nblk = -(-B // tb)
    bp = nblk * tb        # output is allocated padded (cheap); x itself is NOT padded.

    kernel = functools.partial(classifier_kernel, hid1=hid1)
    out = pl.pallas_call(
        kernel,
        out_shape=jax.ShapeDtypeStruct((2, bp), jnp.float32),
        grid=(nblk,),
        in_specs=[
            pl.BlockSpec((tb, F), lambda i: (i, 0)),            # x: batch-tiled (last block ragged)
            pl.BlockSpec((hid1 + 1, F), lambda i: (0, 0)),      # w1t (+label row): VMEM-resident
            pl.BlockSpec((hid1 + 1, 1), lambda i: (0, 0)),      # b1t
            pl.BlockSpec((hid2, hid1), lambda i: (0, 0)),       # w2t
            pl.BlockSpec((hid2, 1), lambda i: (0, 0)),          # b2t
            pl.BlockSpec((1, hid2), lambda i: (0, 0)),          # w3t
            pl.BlockSpec((1, 1), lambda i: (0, 0)),             # b3t
        ],
        out_specs=pl.BlockSpec((2, tb), lambda i: (0, i)),      # lane-dense packed output
        compiler_params=pltpu.CompilerParams(
            dimension_semantics=("parallel",),
            vmem_limit_bytes=VMEM_LIMIT_BYTES),
    )(x, w1t, b1t, w2t, b2t, w3t, b3t)

    # torch: (self.seq(x_).view(-1), label)  -- sigmoid branch.  Tail columns [B:bp) of `out`
    # come from the ragged last x block (garbage rows) and are sliced off here by design.
    probs = out[0, :B]
    labels = out[1, :B].astype(jnp.int32)
    return probs, labels


def classifier_reference(x, raw_params, start_end):
    """Pure-JAX reference of the torch forward (sigmoid branch)."""
    s, e = start_end
    w1, b1, w2, b2, w3, b3 = raw_params
    x_ = jnp.concatenate([x[:, :s], x[:, e:]], axis=1)
    h = x_ @ w1 + b1
    h = jnp.where(h > 0, h, NEG_SLOPE * h)
    h = h @ w2 + b2
    h = jnp.where(h > 0, h, NEG_SLOPE * h)
    logit = h @ w3 + b3
    prob = jax.nn.sigmoid(logit).reshape(-1)
    label = jnp.argmax(x[:, s:e], axis=1).astype(jnp.int32)
    return prob, label


if __name__ == "__main__":
    key = jax.random.PRNGKey(0)
    k_f1, k_l1, k_f2, k_l2, k_p = jax.random.split(key, 5)

    input_dim = 12
    start_end = (4, 6)               # label width 2 -> sigmoid head
    class_dims = (32, 16)
    feat_dim = input_dim - (start_end[1] - start_end[0])   # 10

    raw_params = init_params(k_p, feat_dim, class_dims, out_dim=1)
    packed = prepare_params(raw_params, input_dim, start_end)

    def make_x(kf, kl, batch):
        # Random features; label columns are one-hot 0/1 (as in the GAN upsampler's data).
        xv = jax.random.normal(kf, (batch, input_dim), dtype=jnp.float32)
        onehot = jax.nn.one_hot(
            jax.random.bernoulli(kl, 0.5, (batch,)).astype(jnp.int32), 2, dtype=jnp.float32)
        s, e = start_end
        return xv.at[:, s:e].set(onehot)

    # Small batch: single tile, block == full output width.
    B1 = 8
    x1 = make_x(k_f1, k_l1, B1)
    probs1, labels1 = classifier_forward(x1, packed, start_end)
    jax.block_until_ready((probs1, labels1))
    ref_p1, ref_l1 = classifier_reference(x1, raw_params, start_end)
    assert probs1.shape == (B1,) and labels1.shape == (B1,)
    assert bool(jnp.all(jnp.abs(probs1 - ref_p1) < 1e-2))
    assert bool(jnp.all(labels1 == ref_l1))
    assert bool(jnp.all((probs1 >= 0.0) & (probs1 <= 1.0)))

    # Larger batch: multi-step "parallel" grid with a ragged last x block (no wrapper pad).
    B2 = 1500
    x2 = make_x(k_f2, k_l2, B2)
    probs2, labels2 = classifier_forward(x2, packed, start_end)
    jax.block_until_ready((probs2, labels2))
    ref_p2, ref_l2 = classifier_reference(x2, raw_params, start_end)
    assert probs2.shape == (B2,) and labels2.shape == (B2,)
    assert bool(jnp.all(jnp.abs(probs2 - ref_p2) < 1e-2))
    assert bool(jnp.all(labels2 == ref_l2))

    print("KERNEL_OK")
</pallas_src>

<mosaic_0001>
module attributes {stable_mosaic.version = 11 : i64} {
  func.func @classifier_kernel(%arg0: i32, %arg1: memref<8x12xf32, #tpu.memory_space<vmem>>, %arg2: memref<33x12xf32, #tpu.memory_space<vmem>>, %arg3: memref<33x1xf32, #tpu.memory_space<vmem>>, %arg4: memref<16x32xf32, #tpu.memory_space<vmem>>, %arg5: memref<16x1xf32, #tpu.memory_space<vmem>>, %arg6: memref<1x16xf32, #tpu.memory_space<vmem>>, %arg7: memref<1x1xf32, #tpu.memory_space<vmem>>, %arg8: memref<2x8xf32, #tpu.memory_space<vmem>>) attributes {dimension_semantics = [#tpu.dimension_semantics<parallel>], iteration_bounds = array<i64: 1>, scalar_prefetch = 0 : i64, scratch_operands = 0 : i64, tpu.core_type = #tpu.core_type<tc>, window_params = [{transform_indices = @transform_0, window_bounds = array<i64: 8, 12>}, {pipeline_mode = #tpu.pipeline_mode<synchronous>, transform_indices = @transform_1, window_bounds = array<i64: 33, 12>}, {pipeline_mode = #tpu.pipeline_mode<synchronous>, transform_indices = @transform_2, window_bounds = array<i64: 33, 1>}, {pipeline_mode = #tpu.pipeline_mode<synchronous>, transform_indices = @transform_3, window_bounds = array<i64: 16, 32>}, {pipeline_mode = #tpu.pipeline_mode<synchronous>, transform_indices = @transform_4, window_bounds = array<i64: 16, 1>}, {pipeline_mode = #tpu.pipeline_mode<synchronous>, transform_indices = @transform_5, window_bounds = array<i64: 1, 16>}, {pipeline_mode = #tpu.pipeline_mode<synchronous>, transform_indices = @transform_6, window_bounds = array<i64: 1, 1>}, {transform_indices = @transform_7, window_bounds = array<i64: 2, 8>}]} {
    %c0 = arith.constant 0 : index
    %c0_0 = arith.constant 0 : index
    %0 = vector.load %arg1[%c0, %c0_0] : memref<8x12xf32, #tpu.memory_space<vmem>>, vector<8x12xf32>
    %c0_1 = arith.constant 0 : index
    %c0_2 = arith.constant 0 : index
    %1 = vector.load %arg2[%c0_1, %c0_2] : memref<33x12xf32, #tpu.memory_space<vmem>>, vector<33x12xf32>
    %cst = arith.constant dense<0.000000e+00> : vector<33x8xf32>
    %2 = tpu.matmul %1, %0, %cst {dimension_numbers = #tpu.dot_dimension_numbers<[1], [1], [0], [0], [0, 0, 1, 0], [], []>} : vector<33x12xf32>, vector<8x12xf32>, vector<33x8xf32> -> vector<33x8xf32>
    %c0_3 = arith.constant 0 : index
    %c0_4 = arith.constant 0 : index
    %3 = vector.load %arg3[%c0_3, %c0_4] : memref<33x1xf32, #tpu.memory_space<vmem>>, vector<33x1xf32>
    %4 = vector.broadcast %3 : vector<33x1xf32> to vector<33x8xf32>
    %5 = arith.addf %2, %4 : vector<33x8xf32>
    %cst_5 = arith.constant 0.000000e+00 : f32
    %6 = vector.broadcast %cst_5 : f32 to vector<33x8xf32>
    %7 = arith.cmpf ogt, %5, %6 : vector<33x8xf32>
    %cst_6 = arith.constant 3.000000e-01 : f32
    %8 = vector.broadcast %cst_6 : f32 to vector<33x8xf32>
    %9 = arith.mulf %8, %5 : vector<33x8xf32>
    %10 = arith.select %7, %5, %9 : vector<33x8xi1>, vector<33x8xf32>
    %11 = vector.extract_strided_slice %10 {offsets = [32, 0], sizes = [1, 8], strides = [1, 1]} : vector<33x8xf32> to vector<1x8xf32>
    %cst_7 = arith.constant 0.000000e+00 : f32
    %12 = vector.broadcast %cst_7 : f32 to vector<1x8xf32>
    %13 = arith.cmpf ogt, %11, %12 : vector<1x8xf32>
    %14 = arith.extui %13 : vector<1x8xi1> to vector<1x8xi32>
    %15 = arith.sitofp %14 : vector<1x8xi32> to vector<1x8xf32>
    %16 = vector.extract_strided_slice %10 {offsets = [0, 0], sizes = [32, 8], strides = [1, 1]} : vector<33x8xf32> to vector<32x8xf32>
    %c0_8 = arith.constant 0 : index
    %c0_9 = arith.constant 0 : index
    %17 = vector.load %arg4[%c0_8, %c0_9] : memref<16x32xf32, #tpu.memory_space<vmem>>, vector<16x32xf32>
    %cst_10 = arith.constant dense<0.000000e+00> : vector<16x8xf32>
    %18 = tpu.matmul %17, %16, %cst_10 {dimension_numbers = #tpu.dot_dimension_numbers<[1], [0], [0], [1], [0, 0, 1, 1], [], []>} : vector<16x32xf32>, vector<32x8xf32>, vector<16x8xf32> -> vector<16x8xf32>
    %c0_11 = arith.constant 0 : index
    %c0_12 = arith.constant 0 : index
    %19 = vector.load %arg5[%c0_11, %c0_12] : memref<16x1xf32, #tpu.memory_space<vmem>>, vector<16x1xf32>
    %20 = vector.broadcast %19 : vector<16x1xf32> to vector<16x8xf32>
    %21 = arith.addf %18, %20 : vector<16x8xf32>
    %cst_13 = arith.constant 0.000000e+00 : f32
    %22 = vector.broadcast %cst_13 : f32 to vector<16x8xf32>
    %23 = arith.cmpf ogt, %21, %22 : vector<16x8xf32>
    %cst_14 = arith.constant 3.000000e-01 : f32
    %24 = vector.broadcast %cst_14 : f32 to vector<16x8xf32>
    %25 = arith.mulf %24, %21 : vector<16x8xf32>
    %26 = arith.select %23, %21, %25 : vector<16x8xi1>, vector<16x8xf32>
    %c0_15 = arith.constant 0 : index
    %c0_16 = arith.constant 0 : index
    %27 = vector.load %arg6[%c0_15, %c0_16] : memref<1x16xf32, #tpu.memory_space<vmem>>, vector<1x16xf32>
    %cst_17 = arith.constant dense<0.000000e+00> : vector<1x8xf32>
    %28 = tpu.matmul %27, %26, %cst_17 {dimension_numbers = #tpu.dot_dimension_numbers<[1], [0], [0], [1], [0, 0, 1, 1], [], []>} : vector<1x16xf32>, vector<16x8xf32>, vector<1x8xf32> -> vector<1x8xf32>
    %c0_18 = arith.constant 0 : index
    %c0_19 = arith.constant 0 : index
    %29 = vector.load %arg7[%c0_18, %c0_19] : memref<1x1xf32, #tpu.memory_space<vmem>>, vector<1x1xf32>
    %30 = vector.broadcast %29 : vector<1x1xf32> to vector<1x8xf32>
    %31 = arith.addf %28, %30 : vector<1x8xf32>
    %cst_20 = arith.constant 0.000000e+00 : f32
    %32 = vector.broadcast %cst_20 : f32 to vector<1x8xf32>
    %33 = arith.subf %32, %31 : vector<1x8xf32>
    %34 = math.exp %33 : vector<1x8xf32>
    %cst_21 = arith.constant 1.000000e+00 : f32
    %35 = vector.broadcast %cst_21 : f32 to vector<1x8xf32>
    %36 = arith.addf %35, %34 : vector<1x8xf32>
    %cst_22 = arith.constant 1.000000e+00 : f32
    %37 = vector.broadcast %cst_22 : f32 to vector<1x8xf32>
    %38 = arith.divf %37, %36 : vector<1x8xf32>
    %c0_23 = arith.constant 0 : index
    %c0_24 = arith.constant 0 : index
    %39 = vector.load %arg8[%c0_23, %c0_24] : memref<2x8xf32, #tpu.memory_space<vmem>>, vector<1x8xf32>
    tpu.vector_store %arg8[%c0_23, %c0_24], %38 {strides = array<i32>} : memref<2x8xf32, #tpu.memory_space<vmem>>, vector<1x8xf32>,
    %c1 = arith.constant 1 : index
    %c0_25 = arith.constant 0 : index
    %40 = vector.load %arg8[%c1, %c0_25] : memref<2x8xf32, #tpu.memory_space<vmem>>, vector<1x8xf32>
    tpu.vector_store %arg8[%c1, %c0_25], %15 {strides = array<i32>} : memref<2x8xf32, #tpu.memory_space<vmem>>, vector<1x8xf32>,
    return
  }
  func.func @transform_0(%arg0: i32) -> (i32, i32) {
    %c0_i32 = arith.constant 0 : i32
    %c0_i32_0 = arith.constant 0 : i32
    return %arg0, %c0_i32 : i32, i32
  }
  func.func @transform_1(%arg0: i32) -> (i32, i32) {
    %c0_i32 = arith.constant 0 : i32
    %c0_i32_0 = arith.constant 0 : i32
    %c0_i32_1 = arith.constant 0 : i32
    return %c0_i32, %c0_i32_0 : i32, i32
  }
  func.func @transform_2(%arg0: i32) -> (i32, i32) {
    %c0_i32 = arith.constant 0 : i32
    %c0_i32_0 = arith.constant 0 : i32
    %c0_i32_1 = arith.constant 0 : i32
    return %c0_i32, %c0_i32_0 : i32, i32
  }
  func.func @transform_3(%arg0: i32) -> (i32, i32) {
    %c0_i32 = arith.constant 0 : i32
    %c0_i32_0 = arith.constant 0 : i32
    %c0_i32_1 = arith.constant 0 : i32
    return %c0_i32, %c0_i32_0 : i32, i32
  }
  func.func @transform_4(%arg0: i32) -> (i32, i32) {
    %c0_i32 = arith.constant 0 : i32
    %c0_i32_0 = arith.constant 0 : i32
    %c0_i32_1 = arith.constant 0 : i32
    return %c0_i32, %c0_i32_0 : i32, i32
  }
  func.func @transform_5(%arg0: i32) -> (i32, i32) {
    %c0_i32 = arith.constant 0 : i32
    %c0_i32_0 = arith.constant 0 : i32
    %c0_i32_1 = arith.constant 0 : i32
    return %c0_i32, %c0_i32_0 : i32, i32
  }
  func.func @transform_6(%arg0: i32) -> (i32, i32) {
    %c0_i32 = arith.constant 0 : i32
    %c0_i32_0 = arith.constant 0 : i32
    %c0_i32_1 = arith.constant 0 : i32
    return %c0_i32, %c0_i32_0 : i32, i32
  }
  func.func @transform_7(%arg0: i32) -> (i32, i32) {
    %c0_i32 = arith.constant 0 : i32
    %c0_i32_0 = arith.constant 0 : i32
    return %c0_i32, %arg0 : i32, i32
  }
}

</mosaic_0001>

<bundles_post_ra>
// kernel: tpu_custom_call.1
= control target key start
LH: loop header
LB: loop body
LE: loop exit
PB: predicated region body
PF: predicated region fallthrough
CT: control target
= control target key end

     0   :  { %s640_s0 = inlined_call_operand.vmem [shape: f32[8,12], index: 0, kind: input, shape index: {}]   ;;  %s641_s1 = inlined_call_operand.vmem [shape: f32[33,12], index: 1, kind: input, shape index: {}]   ;;  %s642_s2 = inlined_call_operand.vmem [shape: f32[33,1], index: 2, kind: input, shape index: {}]   ;;  %s643_s3 = inlined_call_operand.vmem [shape: f32[16,32], index: 3, kind: input, shape index: {}]   ;;  %s644_s4 = inlined_call_operand.vmem [shape: f32[16,1], index: 4, kind: input, shape index: {}]   ;;  %s645_s5 = inlined_call_operand.vmem [shape: f32[1,16], index: 5, kind: input, shape index: {}]   ;;  %s646_s6 = inlined_call_operand.<no memory space> [shape: f32[1,1], index: 6, kind: input, shape index: {}]   ;;  %s647_s7 = inlined_call_operand.hbm [shape: f32[2,8], index: 7, kind: output, shape index: {}]  }
   0x1   :  { %v12_v0 = vstv %s646_s6 }
   0x2   :  { %13 = vst [vmem:[#allocation2] sm:$0x1] %v12_v0 }
   0x3   :  { %v29_v1 = vld [vmem:[%s640_s0] sm:$0xff]  ;;  %vm65_vm0 = vcmask 97280   ;;  %v508_v2 = vmov 0.0   ;;  %vm509_vm1 = vmmov 0   ;;  %v510_v4 = vmov 0   ;;  %v37_v6 = vld [vmem:[%s642_s2 + $0x10] sm:$0xff] }
   0x4   :  { %427 = vmatprep.subr.mxu0 %v508_v2  ;;  %429 = vmatprep.mubr.msk.f32.mxu0 %vm509_vm1, %v508_v2  ;;  %v30_v3 = vld [vmem:[%s641_s1] sm:$0xff]  ;;  %v36_v7 = vld [vmem:[%s642_s2 + $0x8] sm:$0xff] }
   0x5   :  { %428 = vmatpush3.xpose.msk.msra.mxu0 %vm65_vm0, %v29_v1  ;;  %478 = vset.pattern.permute.xlu0 %v510_v4  ;;  %v35_v5 = vld [vmem:[%s642_s2] sm:$0xff] }
   0x6   :  { %42 = vperm.xlu0 %478, %v35_v5   ;;  %479 = vset.pattern.permute.xlu1 %v510_v4 }
   0x7   :  { %52 = vperm.xlu1 %479, %v37_v6  }
   0x8   :  { %14 = vsyncpa [#allocation4], 0  ;;  %430 = vmatmul.mubr.msk.f32.vlgmr.msra.gmra.mrb[0].mxu0 %vm65_vm0, %v30_v3  ;;  %v38_v8 = vld [vmem:[%s642_s2 + $0x18] sm:$0xff]  ;;  %v31_v9 = vld [vmem:[%s641_s1 + $0x8] sm:$0xff]  ;;  %vm206_vm2 = vcmask 261120   ;;  %vm385_vm8 = vcmask 57344   ;;  %v301_v1 = vlaneseq }
   0x9   :  { %432 = vmatprep.mubr.msk.f32.mxu0 %vm509_vm1, %v508_v2  ;;  %v194_v10 = vld [vmem:[%s644_s4] sm:$0xff]  ;;  %v195_v11 = vld [vmem:[%s644_s4 + $0x8] sm:$0xff]  ;;  %v32_v12 = vld [vmem:[%s641_s1 + $0x10] sm:$0xff]  ;;  %v511_v53 = vmov 0.0|0.0   ;;  %vm305_vm12 = vcmask 130048   ;;  %s512_s29 = smov [#allocation3]  }
   0xa   :  { %47 = vperm.xlu0 %478, %v36_v7   ;;  %v295_v13 = vld [vmem:[#allocation2] sm:$0x1]  ;;  %v33_v15 = vld [vmem:[%s641_s1 + $0x18] sm:$0xff]  ;;  %v193_v51 = vld [vmem:[%s643_s3 + $0x8] sm:$0xff]  ;;  %s394_s6 = sshll.u32 %s512_s29, 4  ;;  %s395_s6 = int_to_ptr.vmem [resolvable:$true] %s394_s6 }
   0xb   :  { %57 = vperm.xlu1 %479, %v38_v8   ;;  %v39_v14 = vld [vmem:[%s642_s2 + $0x20] sm:$0x1]  ;;  %p489_p1 = scmp.lt.s32.totalorder %s395_s6, %s395_s6 }
   0xc   :  { %433 = vmatmul.mubr.msk.f32.gmra.mrb[2].mxu0 %vm65_vm0, %v31_v9  ;;  %v34_v16 = vld [vmem:[%s641_s1 + $0x20] sm:$0x1] }
   0xd   :  { %435 = vmatprep.mubr.msk.f32.mxu0 %vm509_vm1, %v508_v2  ;;  %v192_v17 = vld [vmem:[%s643_s3] sm:$0xff] }
   0xe   :  { %198 = vperm.xlu0 %478, %v194_v10   ;;  %452 = vmatprep.mubr.msk.f32.mxu1 %vm206_vm2, %v192_v17  ;;  %v294_v0 = vld [vmem:[%s645_s5] sm:$0x1]  ;;  %s484_s5 = scalar_lea.vmem %s395_s6, 32 }
   0xf   :  { %203 = vperm.xlu1 %479, %v195_v11   ;;  %p485_p0 = scmp.ne.s32.totalorder %s395_s6, %s484_s5  ;;  %p490_p2 = scmp.lt.s32.totalorder %s484_s5, %s484_s5 }
  0x10   :  { %436 = vmatmul.mubr.msk.f32.gmra.mrb[4].mxu0 %vm65_vm0, %v32_v12 }
  0x11   :  { %438 = vmatprep.mubr.msk.f32.mxu0 %vm509_vm1, %v508_v2  ;;  %p491_p3 = por %p490_p2, %p489_p1 }
  0x12   :  { %298 = vperm.xlu0 %478, %v295_v13  }
  0x13   :  { %62 = vperm.xlu1 %479, %v39_v14   ;;  %p492_p4 = pnand %p491_p3, %p485_p0 }
  0x14   :  { %439 = vmatmul.mubr.msk.f32.gmra.mrb[6].mxu0 %vm65_vm0, %v33_v15 }
  0x15   :  { %441 = vmatprep.mubr.msk.f32.mxu0 %vm509_vm1, %v508_v2 }
  0x18   :  { %442 = vmatmul.mubr.msk.f32.gmra.mrb[8].mxu0 %vm65_vm0, %v34_v16 }
  0x85   :  { %v43_v18 = vpop.permute.xlu0 %42 }
  0x86   :  { %v53_v19 = vpop.permute.xlu1 %52 }
  0x89   :  { %v48_v23 = vpop.permute.xlu0 %47 }
  0x8a   :  { %v58_v24 = vpop.permute.xlu1 %57 }
  0x8d   :  { %v199_v55 = vpop.permute.xlu0 %198 }
  0x8e   :  { %v204_v35 = vpop.permute.xlu1 %203 }
  0x91   :  { %v299_v4 = vpop.permute.xlu0 %298 }
  0x92   :  { %v63_v42 = vpop.permute.xlu1 %62 }
  0xdb   :  { %v150_v20 = vpop.f32.mrb[0].mxu0 }
  0xdc   :  { %v151_v21 = vadd.f32 %v150_v20, %v43_v18  ;;  %v431_v22 = vpop.f32.mrb[1].mxu0 }
  0xde   :  { %v179_v26 = vmul.f32 0.3, %v151_v21  ;;  %vm174_vm3 = vcmp.gt.f32.partialorder %v151_v21, 0.0 }
  0xdf   :  { %v155_v25 = vpop.f32.mrb[2].mxu0 }
  0xe0   :  { %v156_v27 = vadd.f32 %v155_v25, %v48_v23  ;;  %v434_v28 = vpop.f32.mrb[3].mxu0  ;;  %v184_v33 = vsel %vm174_vm3, %v151_v21, %v179_v26 }
  0xe2   :  { %v180_v29 = vmul.f32 0.3, %v156_v27  ;;  %vm175_vm4 = vcmp.gt.f32.partialorder %v156_v27, 0.0 }
  0xe3   :  { %v160_v30 = vpop.f32.mrb[4].mxu0 }
  0xe4   :  { %v161_v31 = vadd.f32 %v160_v30, %v53_v19  ;;  %v437_v32 = vpop.f32.mrb[5].mxu0  ;;  %v185_v34 = vsel %vm175_vm4, %v156_v27, %v180_v29 }
  0xe5   :  { %v462_v36 = vpack.c.bf16 %v185_v34, %v184_v33 }
  0xe6   :  { %v181_v38 = vmul.f32 0.3, %v161_v31  ;;  %vm176_vm5 = vcmp.gt.f32.partialorder %v161_v31, 0.0 }
  0xe7   :  { %v165_v37 = vpop.f32.mrb[6].mxu0  ;;  %463 = vmatprep.subr.bf16.mxu1 %v462_v36 }
  0xe8   :  { %v166_v39 = vadd.f32 %v165_v37, %v58_v24  ;;  %v440_v40 = vpop.f32.mrb[7].mxu0  ;;  %465 = vmatpush3.bf16.msra.mxu1 %v462_v36  ;;  %v186_v45 = vsel %vm176_vm5, %v161_v31, %v181_v38 }
  0xea   :  { %vm177_vm6 = vcmp.gt.f32.partialorder %v166_v39, 0.0  ;;  %v182_v41 = vmul.f32 0.3, %v166_v39 }
  0xeb   :  { %v170_v43 = vpop.f32.mrb[8].mxu0 }
  0xec   :  { %v171_v44 = vadd.f32 %v170_v43, %v63_v42  ;;  %v187_v46 = vsel %vm177_vm6, %v166_v39, %v182_v41  ;;  %v443_v47 = vpop.f32.mrb[9].mxu0 }
  0xed   :  { %v466_v48 = vpack.c.bf16 %v187_v46, %v186_v45 }
  0xee   :  { %vm178_vm7 = vcmp.gt.f32.partialorder %v171_v44, 0.0  ;;  %v183_v49 = vmul.f32 0.3, %v171_v44 }
  0xef   :  { %467 = vmatprep.subr.bf16.mxu1 %v466_v48 }
  0xf0   :  { %v188_v50 = vsel %vm178_vm7, %v171_v44, %v183_v49  ;;  %469 = vmatpush3.bf16.msra.mxu1 %v466_v48 }
  0xf1   :  { %vm189_vm9 = vcmp.gt.f32.partialorder %v188_v50, 0.0  ;;  %470 = vmatprep.subr.bf16.mxu1 %v511_v53 }
  0xf2   :  { %v408_v52 = vsel %vm189_vm9, 1.0, %v508_v2 }
  0xf3   :  { %453 = vmatmul.mubr.msk.f32.vlgmr.msra.gmra.mrb[0].mxu1 %vm206_vm2, %v193_v51  ;;  %387 = vst.msk [vmem:[#allocation3 + $0x1] sm:$0x1] %vm385_vm8, %v408_v52 }
  0xf4   :  { %459 = vmatprep.mubr.msk.f32.mxu1 %vm509_vm1, %v508_v2  ;;  %v302_v2 = vshrl.u32 %v301_v1, 7 }
  0xf6   :  { %v303_v3 = vsub.s32 0, %v302_v2 }
  0xf8   :  { %v304_v5 = vrot.slane %v299_v4, %v303_v3 }
 0x1c6   :  { %v454_v54 = vpop.f32.mrb[0].mxu1 }
 0x1c7   :  { %v285_v56 = vadd.f32 %v454_v54, %v204_v35  ;;  %v279_v57 = vpop.f32.mrb[1].mxu1 }
 0x1c8   :  { %v280_v58 = vadd.f32 %v279_v57, %v199_v55 }
 0x1c9   :  { %vm289_vm10 = vcmp.gt.f32.partialorder %v285_v56, 0.0  ;;  %v291_v59 = vmul.f32 0.3, %v285_v56 }
 0x1ca   :  { %vm288_vm11 = vcmp.gt.f32.partialorder %v280_v58, 0.0  ;;  %v290_v60 = vmul.f32 0.3, %v280_v58 }
 0x1cb   :  { %v293_v61 = vsel %vm289_vm10, %v285_v56, %v291_v59 }
 0x1cc   :  { %v292_v62 = vsel %vm288_vm11, %v280_v58, %v290_v60 }
 0x1cd   :  { %v471_v63 = vpack.c.bf16 %v293_v61, %v292_v62 }
 0x1cf   :  { %472 = vmatpush3.bf16.msra.mxu1 %v471_v63 }
 0x1d2   :  { %460 = vmatmul.mubr.msk.f32.vlgmr.msra.gmra.mrb[2].mxu1 %vm305_vm12, %v294_v0 }
 0x2a5   :  { %v375_v6 = vpop.f32.mrb[2].mxu1 }
 0x2a6   :  { %v376_v7 = vadd.f32 %v375_v6, %v304_v5  ;;  %v461_v8 = vpop.f32.mrb[3].mxu1 }
 0x2a8   :  { %v379_v9 = vsub.f32 0.0, %v376_v7 }
 0x2aa   :  { %v380_v10 = vmul.f32 1.442695, %v379_v9 }
 0x2ac   :  { %480 = vpow2.f32 %v380_v10 }
 0x2b6   :  { %v481_v11 = vpop.eup %480 }
 0x2b7   :  { %v382_v12 = vadd.f32 1.0, %v481_v11 }
 0x2b9   :  { %482 = vrcp.f32 %v382_v12 }
 0x2c3   :  { %v483_v13 = vpop.eup %482 }
 0x2c4   :  { %386 = vst.msk [vmem:[#allocation3] sm:$0x1] %vm385_vm8, %v483_v13 }
 0x2c5   :  { %495 = shalt.err (!%p492_p4)
}
 0x2c6   :  { %s496_s8 = scalar_lea.hbm %s647_s7, 32 }
 0x2c7   :  { %p497_p5 = scmp.ne.s32.totalorder %s647_s7, %s496_s8  ;;  %p500_p6 = scmp.lt.u32.totalorder %s496_s8, %s647_s7 }
 0x2c9   :  { %p502_p7 = pnand %p500_p6, %p497_p5 }
 0x2cb   :  { %505 = shalt.err (!%p502_p7)
}
 0x2cc   :  { %397 = dma.vmem_to_hbm [thread:$0]  %s395_s6, 32, %s647_s7, [#allocation4]  }
 0x2cd   :  { %506 = dma.done.wait [#allocation4], 32  }
 0x2ce   :  { %507 = vsyncadd [#allocation4], 4294967264 }
 0x2cf   :  { %401 = vsyncpa [#allocation4], 1 }

</bundles_post_ra>
